<compile_context>
chip_gen: v7x
topology: tpu7x:2x2x1
jax: 0.10.0
libtpu: 0.0.40
codegen_flags: <defaults>
</compile_context>

<pallas_src>
import functools

import jax
import jax.numpy as jnp
from jax.experimental import pallas as pl
from jax.experimental.pallas import tpu as pltpu


def _proj_pool_kernel(x_ref, w_ref, b_ref, o_ref, *, approx_recip):
    """Fused feature/attention projection + softmax(S) + weighted pooling.

    x_ref : (bt, S, H)  input tile (f32 or bf16)
    w_ref : (H, 2P)     fused [W_feat | W_att] (f32 or bf16)
    b_ref : (1, 2P)     fused [b_feat | b_att] (f32)
    o_ref : (bt, P)     pooled sequence representation (f32, lane-dense)
    """
    bt, S, H = x_ref.shape
    P = o_ref.shape[-1]

    # One wide MXU matmul for both projections, f32 accumulation.
    x2d = x_ref[...].reshape(bt * S, H)
    acts = jnp.dot(x2d, w_ref[...], preferred_element_type=jnp.float32)
    acts = (acts + b_ref[...]).reshape(bt, S, 2 * P)

    feat = acts[:, :, :P]
    att = acts[:, :, P:]

    # softmax over the sequence axis (PyTorch dim=-2), all in f32.
    # TODO(synk): for very large S an online (two-pass) softmax over S tiles
    # would be needed; here the full (S, 2P) activation block stays resident.
    att = att - jnp.max(att, axis=1, keepdims=True)
    e = jnp.exp(att)
    denom = jnp.sum(e, axis=1, keepdims=True)
    att = e * pl.reciprocal(denom, approx=approx_recip)

    # attention-weighted pooling over S -> lane-dense (bt, P) output slab.
    o_ref[...] = jnp.sum(att * feat, axis=1).astype(o_ref.dtype)


def _cls_kernel(r_ref, w_ref, b_ref, o_ref):
    """cls_proj over the whole batch in one step: (B, P) @ (P, C) + b."""
    logits = jnp.dot(r_ref[...], w_ref[...], preferred_element_type=jnp.float32)
    o_ref[...] = (logits + b_ref[...]).astype(o_ref.dtype)


def _pick_batch_block(B, S):
    # Aim for >=128 MXU rows per grid step (target 256 for headroom).  When a
    # single step would already hold plenty of rows, split into >=2 steps so
    # the "parallel" grid axis can feed both v7x TensorCores.
    rows_target = 256
    bt = max(1, min(B, pl.cdiv(rows_target, S)))
    if pl.cdiv(B, bt) == 1 and B > 1 and B * S >= 2 * rows_target:
        bt = pl.cdiv(B, 2)
    return bt


def _vmem_limit_bytes(bt, S, H, P, in_itemsize):
    # Double-buffered I/O tiles + live f32 activations, with 4x headroom,
    # clamped to fit the smallest scoped-VMEM budget (v7x has 64 MiB total).
    x_tile = bt * S * H * in_itemsize
    w_fused = H * 2 * P * in_itemsize + 2 * P * 4
    acts_f32 = bt * S * 2 * P * 4
    out_tile = bt * P * 4
    need = 2 * (x_tile + w_fused + out_tile) + 2 * acts_f32
    return int(min(max(4 * need, 8 * 1024 * 1024), 48 * 1024 * 1024))


def image_cls_forward(x, params, *, batch_block=None, matmul_dtype=None,
                      approx_recip=True):
    """x: (B, S, H). params: PyTorch-layout Linear weights. Returns (B, C) logits."""
    B, S, H = x.shape
    P = params["feature_proj_w"].shape[0]
    C = params["cls_proj_w"].shape[0]

    mm_dtype = jnp.dtype(x.dtype if matmul_dtype is None else matmul_dtype)

    # PyTorch Linear: y = x @ W.T + b (W is (out, in)).  Fuse the two projection
    # weights into one (H, 2P) matrix / (1, 2P) bias -> single MXU matmul.
    w_fa = jnp.concatenate(
        [params["feature_proj_w"].T, params["attention_proj_w"].T], axis=1
    ).astype(mm_dtype)                                              # (H, 2P)
    b_fa = jnp.concatenate(
        [params["feature_proj_b"], params["attention_proj_b"]]
    ).reshape(1, 2 * P).astype(jnp.float32)                         # (1, 2P)
    wc = params["cls_proj_w"].T.astype(jnp.float32)                 # (P, C) tiny, keep f32
    bc = params["cls_proj_b"].reshape(1, C).astype(jnp.float32)     # (1, C)

    xm = x.astype(mm_dtype)

    bt = _pick_batch_block(B, S) if batch_block is None else batch_block
    n_blk = pl.cdiv(B, bt)
    Bp = n_blk * bt
    if Bp != B:
        # Zero-pad so every grid step sees a full (bt, S, H) tile; padded rows
        # produce finite garbage that is sliced away below.
        xm = jnp.pad(xm, ((0, Bp - B), (0, 0), (0, 0)))

    in_bytes = mm_dtype.itemsize
    kernel = functools.partial(_proj_pool_kernel, approx_recip=approx_recip)

    seq_repr = pl.pallas_call(
        kernel,
        out_shape=jax.ShapeDtypeStruct((Bp, P), jnp.float32),
        grid_spec=pltpu.PrefetchScalarGridSpec(
            num_scalar_prefetch=0,
            grid=(n_blk,),
            in_specs=[
                pl.BlockSpec((bt, S, H), lambda i: (i, 0, 0)),   # batch tile
                pl.BlockSpec((H, 2 * P), lambda i: (0, 0)),      # fused proj weight
                pl.BlockSpec((1, 2 * P), lambda i: (0, 0)),      # fused proj bias
            ],
            out_specs=pl.BlockSpec((bt, P), lambda i: (i, 0)),   # lane-dense slab
        ),
        compiler_params=pltpu.CompilerParams(
            dimension_semantics=("parallel",),
            vmem_limit_bytes=_vmem_limit_bytes(bt, S, H, P, in_bytes),
        ),
        cost_estimate=pl.CostEstimate(
            flops=2 * Bp * S * H * 2 * P,
            transcendentals=Bp * S * P,
            bytes_accessed=(xm.size * in_bytes
                            + w_fa.size * in_bytes + b_fa.size * 4
                            + Bp * P * 4),
        ),
    )(xm, w_fa, b_fa)

    if Bp != B:
        seq_repr = seq_repr[:B]

    # cls_proj once over the whole (B, P) batch (single grid step).
    logits = pl.pallas_call(
        _cls_kernel,
        out_shape=jax.ShapeDtypeStruct((B, C), x.dtype),
        grid_spec=pltpu.PrefetchScalarGridSpec(
            num_scalar_prefetch=0,
            grid=(1,),
            in_specs=[
                pl.BlockSpec((B, P), lambda i: (0, 0)),
                pl.BlockSpec((P, C), lambda i: (0, 0)),
                pl.BlockSpec((1, C), lambda i: (0, 0)),
            ],
            out_specs=pl.BlockSpec((B, C), lambda i: (0, 0)),
        ),
        compiler_params=pltpu.CompilerParams(
            dimension_semantics=("arbitrary",),
        ),
    )(seq_repr, wc, bc)

    return logits


def init_params(key, hidden_dim, proj_dim, num_class):
    """Deterministic synthetic parameters, PyTorch (out, in) layout."""
    ks = jax.random.split(key, 6)
    scale_h = 1.0 / jnp.sqrt(hidden_dim)
    scale_p = 1.0 / jnp.sqrt(proj_dim)
    return {
        "feature_proj_w":   jax.random.uniform(ks[0], (proj_dim, hidden_dim), jnp.float32, -scale_h, scale_h),
        "feature_proj_b":   jax.random.uniform(ks[1], (proj_dim,), jnp.float32, -scale_h, scale_h),
        "attention_proj_w": jax.random.uniform(ks[2], (proj_dim, hidden_dim), jnp.float32, -scale_h, scale_h),
        "attention_proj_b": jax.random.uniform(ks[3], (proj_dim,), jnp.float32, -scale_h, scale_h),
        "cls_proj_w":       jax.random.uniform(ks[4], (num_class, proj_dim), jnp.float32, -scale_p, scale_p),
        "cls_proj_b":       jax.random.uniform(ks[5], (num_class,), jnp.float32, -scale_p, scale_p),
    }


def image_cls_ref(x, params):
    """Pure-JAX reference mirroring the PyTorch forward exactly."""
    feat = x @ params["feature_proj_w"].T + params["feature_proj_b"]
    att = x @ params["attention_proj_w"].T + params["attention_proj_b"]
    att = jax.nn.softmax(att, axis=-2)
    seq_repr = jnp.sum(att * feat, axis=-2)
    return seq_repr @ params["cls_proj_w"].T + params["cls_proj_b"]


if __name__ == "__main__":
    # (batch, seq, hidden) -> (batch, num_class)
    B, S, H, P, C = 2, 8, 32, 32, 10
    key = jax.random.PRNGKey(0)
    kx, kp = jax.random.split(key)
    x = jax.random.normal(kx, (B, S, H), jnp.float32)
    params = init_params(kp, hidden_dim=H, proj_dim=P, num_class=C)
    ref = image_cls_ref(x, params)

    # 1) Strict correctness: f32 matmuls, exact reciprocal.
    logits_exact = image_cls_forward(x, params, approx_recip=False)
    jax.block_until_ready(logits_exact)
    assert logits_exact.shape == (B, C)
    assert jnp.allclose(logits_exact, ref, atol=1e-4, rtol=1e-4), (
        f"exact-path mismatch: max abs err {jnp.max(jnp.abs(logits_exact - ref))}")

    # 2) Default perf path: EUP approx reciprocal (~2^-12 rel err on the softmax norm).
    logits_fast = image_cls_forward(x, params)
    jax.block_until_ready(logits_fast)
    assert jnp.allclose(logits_fast, ref, atol=2e-3, rtol=2e-3), (
        f"approx-recip mismatch: max abs err {jnp.max(jnp.abs(logits_fast - ref))}")

    # 3) bf16-fed MXU path (v6e/v7x recommendation); acc/softmax/pooling stay f32.
    logits_bf16 = image_cls_forward(x, params, matmul_dtype=jnp.bfloat16)
    jax.block_until_ready(logits_bf16)
    assert jnp.allclose(logits_bf16, ref, atol=5e-2, rtol=5e-2), (
        f"bf16 mismatch: max abs err {jnp.max(jnp.abs(logits_bf16 - ref))}")

    print("KERNEL_OK")
</pallas_src>

<mosaic_0001>
module attributes {stable_mosaic.version = 11 : i64} {
  func.func @_proj_pool_kernel(%arg0: i32, %arg1: memref<2x8x32xf32, #tpu.memory_space<vmem>>, %arg2: memref<32x64xf32, #tpu.memory_space<vmem>>, %arg3: memref<1x64xf32, #tpu.memory_space<vmem>>, %arg4: memref<2x32xf32, #tpu.memory_space<vmem>>) attributes {dimension_semantics = [#tpu.dimension_semantics<parallel>], iteration_bounds = array<i64: 1>, scalar_prefetch = 0 : i64, scratch_operands = 0 : i64, tpu.core_type = #tpu.core_type<tc>, window_params = [{transform_indices = @transform_0, window_bounds = array<i64: 2, 8, 32>}, {pipeline_mode = #tpu.pipeline_mode<synchronous>, transform_indices = @transform_1, window_bounds = array<i64: 32, 64>}, {pipeline_mode = #tpu.pipeline_mode<synchronous>, transform_indices = @transform_2, window_bounds = array<i64: 1, 64>}, {transform_indices = @transform_3, window_bounds = array<i64: 2, 32>}]} {
    %c0 = arith.constant 0 : index
    %c0_0 = arith.constant 0 : index
    %c0_1 = arith.constant 0 : index
    %0 = vector.load %arg1[%c0, %c0_0, %c0_1] : memref<2x8x32xf32, #tpu.memory_space<vmem>>, vector<2x8x32xf32>
    %1 = vector.shape_cast %0 : vector<2x8x32xf32> to vector<16x32xf32>
    %c0_2 = arith.constant 0 : index
    %c0_3 = arith.constant 0 : index
    %2 = vector.load %arg2[%c0_2, %c0_3] : memref<32x64xf32, #tpu.memory_space<vmem>>, vector<32x64xf32>
    %cst = arith.constant dense<0.000000e+00> : vector<16x64xf32>
    %3 = tpu.matmul %1, %2, %cst {dimension_numbers = #tpu.dot_dimension_numbers<[1], [0], [0], [1], [0, 0, 1, 1], [], []>} : vector<16x32xf32>, vector<32x64xf32>, vector<16x64xf32> -> vector<16x64xf32>
    %c0_4 = arith.constant 0 : index
    %c0_5 = arith.constant 0 : index
    %4 = vector.load %arg3[%c0_4, %c0_5] : memref<1x64xf32, #tpu.memory_space<vmem>>, vector<1x64xf32>
    %5 = vector.broadcast %4 : vector<1x64xf32> to vector<16x64xf32>
    %6 = arith.addf %3, %5 : vector<16x64xf32>
    %7 = vector.shape_cast %6 : vector<16x64xf32> to vector<2x8x64xf32>
    %8 = vector.extract_strided_slice %7 {offsets = [0, 0, 0], sizes = [2, 8, 32], strides = [1, 1, 1]} : vector<2x8x64xf32> to vector<2x8x32xf32>
    %9 = vector.extract_strided_slice %7 {offsets = [0, 0, 32], sizes = [2, 8, 32], strides = [1, 1, 1]} : vector<2x8x64xf32> to vector<2x8x32xf32>
    %cst_6 = arith.constant dense<0xFF800000> : vector<2x32xf32>
    %10 = vector.multi_reduction <maximumf>, %9, %cst_6 [1] : vector<2x8x32xf32> to vector<2x32xf32>
    %11 = vector.shape_cast %10 : vector<2x32xf32> to vector<2x1x32xf32>
    %12 = vector.broadcast %11 : vector<2x1x32xf32> to vector<2x8x32xf32>
    %13 = arith.subf %9, %12 : vector<2x8x32xf32>
    %14 = math.exp %13 : vector<2x8x32xf32>
    %cst_7 = arith.constant dense<0.000000e+00> : vector<2x32xf32>
    %15 = vector.multi_reduction <add>, %14, %cst_7 [1] : vector<2x8x32xf32> to vector<2x32xf32>
    %16 = vector.shape_cast %15 : vector<2x32xf32> to vector<2x1x32xf32>
    %17 = tpu.reciprocal %16 : vector<2x1x32xf32> -> vector<2x1x32xf32>
    %18 = vector.broadcast %17 : vector<2x1x32xf32> to vector<2x8x32xf32>
    %19 = arith.mulf %14, %18 : vector<2x8x32xf32>
    %20 = arith.mulf %19, %8 : vector<2x8x32xf32>
    %cst_8 = arith.constant dense<0.000000e+00> : vector<2x32xf32>
    %21 = vector.multi_reduction <add>, %20, %cst_8 [1] : vector<2x8x32xf32> to vector<2x32xf32>
    %c0_9 = arith.constant 0 : index
    %c0_10 = arith.constant 0 : index
    %22 = vector.load %arg4[%c0_9, %c0_10] : memref<2x32xf32, #tpu.memory_space<vmem>>, vector<2x32xf32>
    tpu.vector_store %arg4[%c0_9, %c0_10], %21 {strides = array<i32>} : memref<2x32xf32, #tpu.memory_space<vmem>>, vector<2x32xf32>,
    return
  }
  func.func @transform_0(%arg0: i32) -> (i32, i32, i32) {
    %c0_i32 = arith.constant 0 : i32
    %c0_i32_0 = arith.constant 0 : i32
    %c0_i32_1 = arith.constant 0 : i32
    return %arg0, %c0_i32, %c0_i32_0 : i32, i32, i32
  }
  func.func @transform_1(%arg0: i32) -> (i32, i32) {
    %c0_i32 = arith.constant 0 : i32
    %c0_i32_0 = arith.constant 0 : i32
    %c0_i32_1 = arith.constant 0 : i32
    return %c0_i32, %c0_i32_0 : i32, i32
  }
  func.func @transform_2(%arg0: i32) -> (i32, i32) {
    %c0_i32 = arith.constant 0 : i32
    %c0_i32_0 = arith.constant 0 : i32
    %c0_i32_1 = arith.constant 0 : i32
    return %c0_i32, %c0_i32_0 : i32, i32
  }
  func.func @transform_3(%arg0: i32) -> (i32, i32) {
    %c0_i32 = arith.constant 0 : i32
    %c0_i32_0 = arith.constant 0 : i32
    return %arg0, %c0_i32 : i32, i32
  }
}

</mosaic_0001>

<bundles_post_ra>
// kernel: tpu_custom_call.1
= control target key start
LH: loop header
LB: loop body
LE: loop exit
PB: predicated region body
PF: predicated region fallthrough
CT: control target
= control target key end

     0   :  { %8 = vsyncpa [#allocation3], 0  ;;  %s413_s0 = inlined_call_operand.hbm [shape: f32[2,8,32], index: 0, kind: input, shape index: {}]   ;;  %s414_s1 = inlined_call_operand.hbm [shape: f32[32,64], index: 1, kind: input, shape index: {}]   ;;  %s415_s2 = inlined_call_operand.vmem [shape: f32[1,64], index: 2, kind: input, shape index: {}]   ;;  %s416_s3 = inlined_call_operand.hbm [shape: f32[2,32], index: 3, kind: output, shape index: {}]  }
   0x1   :  { %9 = vsyncpa [#allocation6], 0 }
   0x2   :  { %10 = vsyncpa [#allocation4], 0  ;;  %s341_s12 = smov [#allocation2]   ;;  %s269_s16 = scalar_lea.hbm %s413_s0, 256 }
   0x3   :  { %s16_s13 = sshll.u32 %s341_s12, 4  ;;  %p270_p0 = scmp.ne.s32.totalorder %s413_s0, %s269_s16  ;;  %s17_s13 = int_to_ptr.vmem [resolvable:$true] %s16_s13 }
   0x4   :  { %p273_p1 = scmp.lt.u32.totalorder %s269_s16, %s413_s0 }
   0x6   :  { %p275_p2 = pnand %p273_p1, %p270_p0 }
   0x8   :  { %278 = shalt.err (!%p275_p2)
}
   0x9   :  { %s279_s21 = scalar_lea.vmem %s17_s13, 256  ;;  %p284_p4 = scmp.lt.s32.totalorder %s17_s13, %s17_s13 }
   0xa   :  { %p280_p3 = scmp.ne.s32.totalorder %s17_s13, %s279_s21  ;;  %p285_p5 = scmp.lt.s32.totalorder %s279_s21, %s279_s21 }
   0xc   :  { %p286_p6 = por %p285_p5, %p284_p4 }
   0xe   :  { %p287_p7 = pnand %p286_p6, %p280_p3 }
  0x10   :  { %290 = shalt.err (!%p287_p7)
}
  0x11   :  { %s342_s22 = smov 128   ;;  %s343_s23 = smov 8  }
  0x12   :  { %22 = dma.hbm_to_vmem [thread:$0]  %s413_s0, 256, %s17_s13, [#allocation3], %s342_s22, %s342_s22, %s343_s23  }
  0x13   :  { %s344_s26 = smov [#allocation5]   ;;  %s291_s30 = scalar_lea.hbm %s414_s1, 512 }
  0x14   :  { %s28_s27 = sshll.u32 %s344_s26, 4  ;;  %p292_p8 = scmp.ne.s32.totalorder %s414_s1, %s291_s30  ;;  %s29_s27 = int_to_ptr.vmem [resolvable:$true] %s28_s27 }
  0x15   :  { %p295_p9 = scmp.lt.u32.totalorder %s291_s30, %s414_s1 }
  0x17   :  { %p297_p10 = pnand %p295_p9, %p292_p8 }
  0x19   :  { %300 = shalt.err (!%p297_p10)
}
  0x1a   :  { %s301_s8 = scalar_lea.vmem %s29_s27, 512  ;;  %p306_p12 = scmp.lt.s32.totalorder %s29_s27, %s29_s27 }
  0x1b   :  { %p302_p11 = scmp.ne.s32.totalorder %s29_s27, %s301_s8  ;;  %p307_p13 = scmp.lt.s32.totalorder %s301_s8, %s301_s8 }
  0x1d   :  { %p308_p0 = por %p307_p13, %p306_p12 }
  0x1f   :  { %p309_p1 = pnand %p308_p0, %p302_p11 }
  0x21   :  { %312 = shalt.err (!%p309_p1)
}
  0x22   :  { %34 = dma.hbm_to_vmem [thread:$0]  %s414_s1, 512, %s29_s27, [#allocation6], %s342_s22, %s342_s22, %s343_s23  }
  0x23   :  { %335 = dma.done.wait [#allocation3], 256  }
  0x24   :  { %336 = vsyncadd [#allocation3], 4294967040 }
  0x25   :  { %337 = dma.done.wait [#allocation6], 512  }
  0x26   :  { %338 = vsyncadd [#allocation6], 4294966784  ;;  %vm56_vm0 = vcmask 261120   ;;  %v45_v0 = vld [vmem:[#allocation5] sm:$0xff]  ;;  %v46_v1 = vld [vmem:[#allocation5 + $0x8] sm:$0xff]  ;;  %vm138_vm1 = vcmask 523520  }
  0x27   :  { %v47_v2 = vld [vmem:[#allocation5 + $0x10] sm:$0xff]  ;;  %v246_v3 = vpack.c.bf16 %v46_v1, %v45_v0  ;;  %v48_v4 = vld [vmem:[#allocation5 + $0x18] sm:$0xff]  ;;  %s345_s11 = smov 32   ;;  %vm203_vm2 = vcmask 1041409   ;;  %s347_s12 = smov [#allocation7]   ;;  %vm208_vm3 = vcmask 254976  }
  0x28   :  { %v43_v5 = vld [vmem:[#allocation2] sm:$0xff]  ;;  %v250_v6 = vpack.c.bf16 %v48_v4, %v47_v2  ;;  %v44_v7 = vld [vmem:[#allocation2 + $0x8] sm:$0xff]  ;;  %s216_s13 = sshll.u32 %s347_s12, 4  ;;  %s217_s13 = int_to_ptr.vmem [resolvable:$true] %s216_s13 }
  0x29   :  { %243 = vmatprep.mubr.msk.f32.mxu0 %vm56_vm0, %v43_v5  ;;  %247 = vmatprep.subr.bf16.mxu0 %v246_v3  ;;  %v226_v8 = vld [vmem:[%s415_s2] ss:$0 sm:$0xff]  ;;  %s346_s2 = smov 96   ;;  %s313_s14 = scalar_lea.vmem %s217_s13, 32 }
  0x2a   :  { %249 = vmatpush3.bf16.msra.mxu0 %v246_v3  ;;  %p314_p2 = scmp.ne.s32.totalorder %s217_s13, %s313_s14  ;;  %p318_p3 = scmp.lt.s32.totalorder %s217_s13, %s217_s13 }
  0x2b   :  { %251 = vmatprep.subr.bf16.mxu0 %v250_v6  ;;  %p319_p4 = scmp.lt.s32.totalorder %s313_s14, %s313_s14 }
  0x2d   :  { %p320_p5 = por %p319_p4, %p318_p3 }
  0x2e   :  { %253 = vmatpush3.bf16.msra.mxu0 %v250_v6 }
  0x2f   :  { %p321_p6 = pnand %p320_p5, %p314_p2 }
  0x31   :  { %244 = vmatmul.mubr.msk.f32.vlgmr.msra.gmra.mrb[0].mxu0 %vm56_vm0, %v44_v7 }
 0x104   :  { %v245_v9 = vpop.f32.mrb[0].mxu0 }
 0x105   :  { %v135_v10 = vadd.f32 %v245_v9, %v226_v8  ;;  %v129_v11 = vpop.f32.mrb[1].mxu0 }
 0x106   :  { %v130_v12 = vadd.f32 %v226_v8, %v129_v11 }
 0x107   :  { %v146_v13 = vsel %vm138_vm1, %v135_v10, -inf }
 0x108   :  { %v147_v14 = vrot.slane %v146_v13, 4  ;;  %179 = vrot.lane.b32.xlu0 %v130_v12, %s345_s11  ;;  %v139_v21 = vsel %vm138_vm1, %v130_v12, -inf }
 0x109   :  { %v140_v22 = vrot.slane %v139_v21, 4 }
 0x10a   :  { %v148_v15 = vmax.f32 %v146_v13, %v147_v14 }
 0x10b   :  { %v141_v23 = vmax.f32 %v139_v21, %v140_v22 }
 0x10c   :  { %v149_v16 = vrot.slane %v148_v15, 2  ;;  %181 = vrot.lane.b32.xlu0 %v135_v10, %s345_s11 }
 0x10d   :  { %v142_v24 = vrot.slane %v141_v23, 2 }
 0x10e   :  { %v150_v17 = vmax.f32 %v148_v15, %v149_v16 }
 0x10f   :  { %v143_v25 = vmax.f32 %v141_v23, %v142_v24 }
 0x110   :  { %v151_v18 = vrot.slane %v150_v17, 1 }
 0x111   :  { %v144_v26 = vrot.slane %v143_v25, 1 }
 0x112   :  { %v152_v19 = vmax.f32 %v150_v17, %v151_v18 }
 0x113   :  { %v145_v27 = vmax.f32 %v143_v25, %v144_v26 }
 0x114   :  { %v154_v20 = vsub.f32 %v135_v10, %v152_v19 }
 0x115   :  { %v153_v28 = vsub.f32 %v130_v12, %v145_v27 }
 0x116   :  { %v157_v30 = vmul.f32 1.442695, %v154_v20 }
 0x117   :  { %v155_v29 = vmul.f32 1.442695, %v153_v28 }
 0x119   :  { %261 = vpow2.f32 %v155_v29 }
 0x11a   :  { %263 = vpow2.f32 %v157_v30 }
 0x123   :  { %v262_v31 = vpop.eup %261 }
 0x124   :  { %v159_v32 = vsel %vm138_vm1, %v262_v31, 0.0  ;;  %v264_v33 = vpop.eup %263 }
 0x125   :  { %v160_v34 = vrot.slane %v159_v32, 4  ;;  %v166_v35 = vsel %vm138_vm1, %v264_v33, 0.0 }
 0x126   :  { %v167_v36 = vrot.slane %v166_v35, 4 }
 0x127   :  { %v161_v37 = vadd.f32 %v160_v34, %v159_v32 }
 0x128   :  { %v168_v39 = vadd.f32 %v167_v36, %v166_v35 }
 0x129   :  { %v162_v38 = vrot.slane %v161_v37, 2 }
 0x12a   :  { %v169_v41 = vrot.slane %v168_v39, 2 }
 0x12b   :  { %v163_v40 = vadd.f32 %v162_v38, %v161_v37 }
 0x12c   :  { %v170_v43 = vadd.f32 %v169_v41, %v168_v39 }
 0x12d   :  { %v164_v42 = vrot.slane %v163_v40, 1 }
 0x12e   :  { %v171_v45 = vrot.slane %v170_v43, 1 }
 0x12f   :  { %v165_v44 = vadd.f32 %v164_v42, %v163_v40 }
 0x130   :  { %v172_v46 = vadd.f32 %v171_v45, %v170_v43 }
 0x131   :  { %265 = vrcp.f32 %v165_v44 }
 0x132   :  { %267 = vrcp.f32 %v172_v46 }
 0x13b   :  { %v266_v47 = vpop.eup %265 }
 0x13c   :  { %v175_v48 = vmul.f32 %v266_v47, %v262_v31  ;;  %v268_v49 = vpop.eup %267 }
 0x13d   :  { %v176_v53 = vmul.f32 %v268_v49, %v264_v33 }
 0x17a   :  { %v180_v50 = vpop.permute.xlu0 %179 }
 0x17b   :  { %v185_v51 = vmul.f32 %v180_v50, %v175_v48 }
 0x17d   :  { %v187_v52 = vsel %vm138_vm1, %v185_v51, 0.0 }
 0x17e   :  { %v188_v54 = vrot.slane %v187_v52, 4  ;;  %v182_v55 = vpop.permute.xlu0 %181 }
 0x17f   :  { %v186_v56 = vmul.f32 %v182_v55, %v176_v53 }
 0x180   :  { %v189_v57 = vadd.f32 %v188_v54, %v187_v52 }
 0x181   :  { %v194_v58 = vsel %vm138_vm1, %v186_v56, 0.0 }
 0x182   :  { %v190_v59 = vrot.slane %v189_v57, 2  ;;  %v195_v60 = vrot.slane %v194_v58, 4 }
 0x184   :  { %v191_v61 = vadd.f32 %v190_v59, %v189_v57  ;;  %v196_v62 = vadd.f32 %v195_v60, %v194_v58 }
 0x186   :  { %v197_v63 = vrot.slane %v196_v62, 2  ;;  %v192_v1 = vrot.slane %v191_v61, 1 }
 0x188   :  { %v198_v0 = vadd.f32 %v197_v63, %v196_v62  ;;  %v193_v3 = vadd.f32 %v192_v1, %v191_v61 }
 0x18a   :  { %v199_v2 = vrot.slane %v198_v0, 1 }
 0x18c   :  { %v200_v4 = vadd.f32 %v199_v2, %v198_v0 }
 0x18e   :  { %v204_v5 = vsel %vm203_vm2, %v200_v4, %v193_v3 }
 0x18f   :  { %205 = vrot.lane.b32.xlu1 %v204_v5, %s346_s2 }
 0x201   :  { %v206_v6 = vpop.permute.xlu1 %205 }
 0x202   :  { %209 = vst.msk [vmem:[#allocation7] sm:$0x3] %vm208_vm3, %v206_v6 }
 0x203   :  { %324 = shalt.err (!%p321_p6)
}
 0x204   :  { %s325_s17 = scalar_lea.hbm %s416_s3, 32 }
 0x205   :  { %p326_p7 = scmp.ne.s32.totalorder %s416_s3, %s325_s17  ;;  %p329_p8 = scmp.lt.u32.totalorder %s325_s17, %s416_s3 }
 0x207   :  { %p331_p9 = pnand %p329_p8, %p326_p7 }
 0x209   :  { %334 = shalt.err (!%p331_p9)
}
 0x20a   :  { %219 = dma.vmem_to_hbm [thread:$0]  %s217_s13, 32, %s416_s3, [#allocation4]  }
 0x20b   :  { %339 = dma.done.wait [#allocation4], 32  }
 0x20c   :  { %340 = vsyncadd [#allocation4], 4294967264 }
 0x20d   :  { %223 = vsyncpa [#allocation3], 1 }
 0x20e   :  { %224 = vsyncpa [#allocation6], 1 }
 0x20f   :  { %225 = vsyncpa [#allocation4], 1 }

</bundles_post_ra>
